<compile_context>
chip_gen: v5e
topology: v5e:2x2
jax: 0.10.0
libtpu: 0.0.40
codegen_flags: <defaults>
</compile_context>

<pallas_src>
import math
import jax
import jax.numpy as jnp
from jax.experimental import pallas as pl
from jax.experimental.pallas import tpu as pltpu


_SQRT_HALF = 1.0 / math.sqrt(2.0)


def _gelu_exact(x):
    # nn.GELU() default = exact erf-based GELU (computed in f32).
    # TODO(synk): optional tanh-approx GELU (EUP slot) as a v5e perf knob.
    return 0.5 * x * (1.0 + jax.lax.erf(x * _SQRT_HALF))


def _round_up(v, m):
    return (v + m - 1) // m * m


def mlp_kernel(x_ref, w1_ref, b1_ref, w2_ref, b2_ref, o_ref):
    # Cast x -> compute dtype in-kernel (VPU work, hidden under the MXU) rather
    # than paying an extra un-pipelined HBM pass in the wrapper.
    x = x_ref[...].astype(w1_ref.dtype)
    # fc1: MXU matmul, f32 accumulation; bias add in f32.
    h = jnp.dot(x, w1_ref[...], preferred_element_type=jnp.float32)
    h = h + b1_ref[...]
    # Exact erf GELU in f32 (matches nn.GELU() default).
    h = _gelu_exact(h)
    # dropout: inference mode == identity.
    # TODO(synk): training-mode dropout via pltpu.prng_seed + pltpu.prng_random_bits.
    # fc2: MXU matmul, f32 accumulation; bias add in f32.
    y = jnp.dot(h.astype(w2_ref.dtype), w2_ref[...],
                preferred_element_type=jnp.float32)
    y = y + b2_ref[...]
    o_ref[...] = y.astype(o_ref.dtype)


def prepare_mlp_params(w1, b1, w2, b2, *, compute_dtype=jnp.bfloat16):
    """One-time weight prep (do NOT call per-forward).

    Casts fc weights to the MXU compute dtype and reshapes biases to (1, .) f32
    so each forward call only reads the prepared tensors.
    """
    w1c = jnp.asarray(w1, compute_dtype)
    w2c = jnp.asarray(w2, compute_dtype)
    b1c = jnp.asarray(b1, jnp.float32).reshape(1, -1)
    b2c = jnp.asarray(b2, jnp.float32).reshape(1, -1)
    return w1c, b1c, w2c, b2c


def mlp_forward(x, w1c, b1c, w2c, b2c, *, tile_m=None):
    """x: (..., D) -> same shape.  fc1 + GELU + fc2 fused in one Pallas kernel.

    - Token axis tiled (partial last tile handled by Pallas masking; no
      wrapper-side pad copies of activations).
    - Feature dims used full-extent in each block; for real ViT dims
      (384/768/1024 and 4x hidden) they are 128-multiples -> lane-dense.
    - Weights resident in VMEM once (constant index_map + Buffered(1));
      x/out tiles double-buffered and pipelined.
    """
    orig_shape = x.shape
    out_dtype = x.dtype
    D = orig_shape[-1]
    H = w1c.shape[1]
    x2 = x.reshape(-1, D)
    N = x2.shape[0]

    x_size = x2.dtype.itemsize
    w_size = w1c.dtype.itemsize
    o_size = jnp.dtype(out_dtype).itemsize

    # Generation-aware per-TensorCore VMEM capacity (v5e/v6e: 128 MiB, v7x: 64 MiB).
    try:
        vmem_cap = int(pltpu.get_tpu_info().vmem_capacity_bytes)
    except Exception:
        vmem_cap = 64 * 2**20  # conservative fallback

    if tile_m is None:
        tile_m = 512 if N >= 512 else 256
    tile_m = max(16, min(tile_m, _round_up(N, 16)))

    def vmem_needed(tm):
        return (2 * tm * D * x_size        # double-buffered x tiles
                + 2 * tm * D * o_size      # double-buffered out tiles
                + 2 * D * H * w_size       # W1 + W2, single-buffered (Buffered(1))
                + tm * H * 4               # f32 hidden activations
                + (H + D) * 4)             # biases

    # Shrink the token tile if the footprint would blow the per-TC budget.
    while vmem_needed(tile_m) > int(0.8 * vmem_cap) and tile_m > 64:
        tile_m //= 2
    # TODO(synk): if the weights alone exceed VMEM (very large H), stream W1/W2
    # over an H grid axis (pl.when init/finalize accumulation) instead of full
    # residency.

    grid_m = pl.cdiv(N, tile_m)
    vmem_limit = int(min(max(vmem_needed(tile_m) + (4 << 20), 32 * 2**20),
                         int(0.875 * vmem_cap)))

    cost = pl.CostEstimate(
        flops=2 * N * D * H * 2,               # two (N,D)x(D,H)/(N,H)x(H,D) matmuls
        transcendentals=N * H,                 # erf per hidden activation
        bytes_accessed=(N * D * (x_size + o_size)
                        + 2 * D * H * w_size
                        + (H + D) * 4),
    )

    # Constant index_map -> never re-fetched -> single buffer is enough.
    resident = dict(pipeline_mode=pl.Buffered(1))

    out = pl.pallas_call(
        mlp_kernel,
        out_shape=jax.ShapeDtypeStruct((N, D), out_dtype),
        grid_spec=pltpu.PrefetchScalarGridSpec(
            num_scalar_prefetch=0,
            grid=(grid_m,),
            in_specs=[
                pl.BlockSpec((tile_m, D), lambda i: (i, 0)),              # x tile
                pl.BlockSpec((D, H), lambda i: (0, 0), **resident),       # W1
                pl.BlockSpec((1, H), lambda i: (0, 0), **resident),       # b1
                pl.BlockSpec((H, D), lambda i: (0, 0), **resident),       # W2
                pl.BlockSpec((1, D), lambda i: (0, 0), **resident),       # b2
            ],
            out_specs=pl.BlockSpec((tile_m, D), lambda i: (i, 0)),
        ),
        compiler_params=pltpu.CompilerParams(
            dimension_semantics=("parallel",),   # shards token tiles across TCs
            vmem_limit_bytes=vmem_limit,
        ),
        cost_estimate=cost,
    )(x2, w1c, b1c, w2c, b2c)

    return out.reshape(orig_shape)


def init_mlp_params(key, in_features, hidden_features, dtype=jnp.float32):
    # Deterministic init mimicking nn.Linear default (uniform +/- 1/sqrt(fan_in)).
    k1, k2, k3, k4 = jax.random.split(key, 4)
    bound1 = 1.0 / math.sqrt(in_features)
    bound2 = 1.0 / math.sqrt(hidden_features)
    w1 = jax.random.uniform(k1, (in_features, hidden_features), dtype,
                            minval=-bound1, maxval=bound1)
    b1 = jax.random.uniform(k2, (hidden_features,), dtype,
                            minval=-bound1, maxval=bound1)
    w2 = jax.random.uniform(k3, (hidden_features, in_features), dtype,
                            minval=-bound2, maxval=bound2)
    b2 = jax.random.uniform(k4, (in_features,), dtype,
                            minval=-bound2, maxval=bound2)
    return w1, b1, w2, b2


if __name__ == "__main__":
    # Shapes implied by a ViT MLP: (batch, seq, in_features)
    batch, seq = 2, 8
    in_features, hidden_features = 32, 64
    drop_rate = 0.0  # inference-mode dropout == identity

    key = jax.random.PRNGKey(0)
    kx, kp = jax.random.split(key)
    x = jax.random.normal(kx, (batch, seq, in_features), jnp.float32)
    w1, b1, w2, b2 = init_mlp_params(kp, in_features, hidden_features)

    # One-time weight prep (cast + bias reshape) outside the per-call path.
    w1c, b1c, w2c, b2c = prepare_mlp_params(w1, b1, w2, b2)

    y = mlp_forward(x, w1c, b1c, w2c, b2c)
    y = jax.block_until_ready(y)

    # f32 reference; kernel matmuls run in bf16 -> loosened tolerance.
    h_ref = x @ w1 + b1
    h_ref = 0.5 * h_ref * (1.0 + jax.lax.erf(h_ref / math.sqrt(2.0)))
    y_ref = h_ref @ w2 + b2
    assert y.shape == (batch, seq, in_features)
    err = float(jnp.max(jnp.abs(y - y_ref)))
    assert jnp.allclose(y, y_ref, atol=5e-2, rtol=5e-2), err

    print("KERNEL_OK")
</pallas_src>

<mosaic_0001>
module attributes {stable_mosaic.version = 11 : i64} {
  func.func @mlp_kernel(%arg0: i32, %arg1: memref<16x32xf32, #tpu.memory_space<vmem>>, %arg2: memref<32x64xbf16, #tpu.memory_space<vmem>>, %arg3: memref<1x64xf32, #tpu.memory_space<vmem>>, %arg4: memref<64x32xbf16, #tpu.memory_space<vmem>>, %arg5: memref<1x32xf32, #tpu.memory_space<vmem>>, %arg6: memref<16x32xf32, #tpu.memory_space<vmem>>) attributes {dimension_semantics = [#tpu.dimension_semantics<parallel>], iteration_bounds = array<i64: 1>, scalar_prefetch = 0 : i64, scratch_operands = 0 : i64, tpu.core_type = #tpu.core_type<tc>, window_params = [{transform_indices = @transform_0, window_bounds = array<i64: 16, 32>}, {pipeline_mode = #tpu.pipeline_mode<synchronous>, transform_indices = @transform_1, window_bounds = array<i64: 32, 64>}, {pipeline_mode = #tpu.pipeline_mode<synchronous>, transform_indices = @transform_2, window_bounds = array<i64: 1, 64>}, {pipeline_mode = #tpu.pipeline_mode<synchronous>, transform_indices = @transform_3, window_bounds = array<i64: 64, 32>}, {pipeline_mode = #tpu.pipeline_mode<synchronous>, transform_indices = @transform_4, window_bounds = array<i64: 1, 32>}, {transform_indices = @transform_5, window_bounds = array<i64: 16, 32>}]} {
    %c0 = arith.constant 0 : index
    %c0_0 = arith.constant 0 : index
    %0 = vector.load %arg1[%c0, %c0_0] : memref<16x32xf32, #tpu.memory_space<vmem>>, vector<16x32xf32>
    %1 = arith.truncf %0 : vector<16x32xf32> to vector<16x32xbf16>
    %c0_1 = arith.constant 0 : index
    %c0_2 = arith.constant 0 : index
    %2 = vector.load %arg2[%c0_1, %c0_2] : memref<32x64xbf16, #tpu.memory_space<vmem>>, vector<32x64xbf16>
    %cst = arith.constant dense<0.000000e+00> : vector<16x64xf32>
    %3 = tpu.matmul %1, %2, %cst {dimension_numbers = #tpu.dot_dimension_numbers<[1], [0], [0], [1], [0, 0, 1, 1], [], []>} : vector<16x32xbf16>, vector<32x64xbf16>, vector<16x64xf32> -> vector<16x64xf32>
    %c0_3 = arith.constant 0 : index
    %c0_4 = arith.constant 0 : index
    %4 = vector.load %arg3[%c0_3, %c0_4] : memref<1x64xf32, #tpu.memory_space<vmem>>, vector<1x64xf32>
    %5 = vector.broadcast %4 : vector<1x64xf32> to vector<16x64xf32>
    %6 = arith.addf %3, %5 : vector<16x64xf32>
    %cst_5 = arith.constant 5.000000e-01 : f32
    %7 = vector.broadcast %cst_5 : f32 to vector<16x64xf32>
    %8 = arith.mulf %7, %6 : vector<16x64xf32>
    %cst_6 = arith.constant 0.707106769 : f32
    %9 = vector.broadcast %cst_6 : f32 to vector<16x64xf32>
    %10 = arith.mulf %6, %9 : vector<16x64xf32>
    %11 = math.erf %10 : vector<16x64xf32>
    %cst_7 = arith.constant 1.000000e+00 : f32
    %12 = vector.broadcast %cst_7 : f32 to vector<16x64xf32>
    %13 = arith.addf %12, %11 : vector<16x64xf32>
    %14 = arith.mulf %8, %13 : vector<16x64xf32>
    %15 = arith.truncf %14 : vector<16x64xf32> to vector<16x64xbf16>
    %c0_8 = arith.constant 0 : index
    %c0_9 = arith.constant 0 : index
    %16 = vector.load %arg4[%c0_8, %c0_9] : memref<64x32xbf16, #tpu.memory_space<vmem>>, vector<64x32xbf16>
    %cst_10 = arith.constant dense<0.000000e+00> : vector<16x32xf32>
    %17 = tpu.matmul %15, %16, %cst_10 {dimension_numbers = #tpu.dot_dimension_numbers<[1], [0], [0], [1], [0, 0, 1, 1], [], []>} : vector<16x64xbf16>, vector<64x32xbf16>, vector<16x32xf32> -> vector<16x32xf32>
    %c0_11 = arith.constant 0 : index
    %c0_12 = arith.constant 0 : index
    %18 = vector.load %arg5[%c0_11, %c0_12] : memref<1x32xf32, #tpu.memory_space<vmem>>, vector<1x32xf32>
    %19 = vector.broadcast %18 : vector<1x32xf32> to vector<16x32xf32>
    %20 = arith.addf %17, %19 : vector<16x32xf32>
    %c0_13 = arith.constant 0 : index
    %c0_14 = arith.constant 0 : index
    %21 = vector.load %arg6[%c0_13, %c0_14] : memref<16x32xf32, #tpu.memory_space<vmem>>, vector<16x32xf32>
    tpu.vector_store %arg6[%c0_13, %c0_14], %20 {strides = array<i32>} : memref<16x32xf32, #tpu.memory_space<vmem>>, vector<16x32xf32>,
    return
  }
  func.func @transform_0(%arg0: i32) -> (i32, i32) {
    %c0_i32 = arith.constant 0 : i32
    %c0_i32_0 = arith.constant 0 : i32
    return %arg0, %c0_i32 : i32, i32
  }
  func.func @transform_1(%arg0: i32) -> (i32, i32) {
    %c0_i32 = arith.constant 0 : i32
    %c0_i32_0 = arith.constant 0 : i32
    %c0_i32_1 = arith.constant 0 : i32
    return %c0_i32, %c0_i32_0 : i32, i32
  }
  func.func @transform_2(%arg0: i32) -> (i32, i32) {
    %c0_i32 = arith.constant 0 : i32
    %c0_i32_0 = arith.constant 0 : i32
    %c0_i32_1 = arith.constant 0 : i32
    return %c0_i32, %c0_i32_0 : i32, i32
  }
  func.func @transform_3(%arg0: i32) -> (i32, i32) {
    %c0_i32 = arith.constant 0 : i32
    %c0_i32_0 = arith.constant 0 : i32
    %c0_i32_1 = arith.constant 0 : i32
    return %c0_i32, %c0_i32_0 : i32, i32
  }
  func.func @transform_4(%arg0: i32) -> (i32, i32) {
    %c0_i32 = arith.constant 0 : i32
    %c0_i32_0 = arith.constant 0 : i32
    %c0_i32_1 = arith.constant 0 : i32
    return %c0_i32, %c0_i32_0 : i32, i32
  }
  func.func @transform_5(%arg0: i32) -> (i32, i32) {
    %c0_i32 = arith.constant 0 : i32
    %c0_i32_0 = arith.constant 0 : i32
    return %arg0, %c0_i32 : i32, i32
  }
}

</mosaic_0001>

<bundles_post_ra>
// kernel: tpu_custom_call.1
= control target key start
LH: loop header
LB: loop body
LE: loop exit
PB: predicated region body
PF: predicated region fallthrough
CT: control target
= control target key end

     0   :  { %s382_s0 = inlined_call_operand.vmem [shape: f32[16,32], index: 0, kind: input, shape index: {}]   ;;  %s383_s1 = inlined_call_operand.vmem [shape: bf16[32,64], index: 1, kind: input, shape index: {}]   ;;  %s384_s2 = inlined_call_operand.vmem [shape: f32[1,64], index: 2, kind: input, shape index: {}]   ;;  %s385_s3 = inlined_call_operand.vmem [shape: bf16[64,32], index: 3, kind: input, shape index: {}]   ;;  %s386_s4 = inlined_call_operand.vmem [shape: f32[1,32], index: 4, kind: input, shape index: {}]   ;;  %s387_s5 = inlined_call_operand.hbm [shape: f32[16,32], index: 5, kind: output, shape index: {}]  }
   0x1   :  { %v255_v0 = vld [vmem:[%s383_s1 + $0x8] sm:$0xff]  ;;  %v254_v1 = vld [vmem:[%s383_s1] sm:$0xff] }
   0x2   :  { %v22_v2 = vld [vmem:[%s382_s0] sm:$0xff]  ;;  %55 = vmatpush.bf16.msra.mxu0 %v255_v0  ;;  %v23_v3 = vld [vmem:[%s382_s0 + $0x8] sm:$0xff] }
   0x3   :  { %10 = vsyncpa [#allocation3], 0  ;;  %v24_v4 = vpack.c.bf16 %v23_v3, %v22_v2  ;;  %vm45_vm0 = vcmask 261120   ;;  %v263_v5 = vld [vmem:[%s384_s2] ss:$0 sm:$0xff]  ;;  %v259_v24 = vld [vmem:[%s385_s3 + $0x18] sm:$0xff] }
   0x4   :  { %196 = vmatpush.bf16.msra.mxu1 %v259_v24  ;;  %v258_v32 = vld [vmem:[%s385_s3 + $0x10] sm:$0xff]  ;;  %v257_v40 = vld [vmem:[%s385_s3 + $0x8] sm:$0xff]  ;;  %v256_v46 = vld [vmem:[%s385_s3] sm:$0xff]  ;;  %vm188_vm9 = vcmask 523264   ;;  %s295_s9 = smov [#allocation2]   ;;  %s214_s13 = sshll.u32 %s387_s5, 4  ;;  %s215_s13 = int_to_ptr.hbm [resolvable:$true] %s214_s13 }
   0x5   :  { %s212_s10 = sshll.u32 %s295_s9, 4  ;;  %s296_s14 = smov 128   ;;  %s213_s10 = int_to_ptr.vmem [resolvable:$true] %s212_s10 }
   0x6   :  { %56 = vmatpush.bf16.msra.mxu0 %v254_v1  ;;  %s297_s15 = smov 8  }
   0x8   :  { %197 = vmatpush.bf16.msra.mxu1 %v258_v32 }
   0x9   :  { %234 = vmatmul.msk.bf16.vlgmr.msra.gmra.mxu0 %vm45_vm0, %v24_v4 }
   0xc   :  { %198 = vmatpush.bf16.msra.mxu1 %v257_v40 }
  0x10   :  { %199 = vmatpush.bf16.msra.mxu1 %v256_v46 }
  0x86   :  { %v58_v6 = vpop.f32.mrf.mxu0 }
  0x87   :  { %v344_v7 = vadd.f32 %v263_v5, %v58_v6 }
  0x89   :  { %v347_v8 = vmul.f32 0.70710677, %v344_v7 }
  0x8b   :  { %v67_v9 = vmul.f32 %v347_v8, %v347_v8 }
  0x8d   :  { %v68_v10 = vmin.f32 %v67_v9, 16.0 }
  0x8e   :  { %v60_v11 = vpop.f32.mrf.mxu0 }
  0x8f   :  { %v69_v12 = vmul.f32 2.1237322e-06, %v68_v10  ;;  %v80_v13 = vmul.f32 3.8918573e-05, %v68_v10  ;;  %v351_v14 = vadd.f32 %v263_v5, %v60_v11 }
  0x91   :  { %v70_v15 = vadd.f32 0.00028619796, %v69_v12  ;;  %v81_v16 = vadd.f32 0.001143296, %v80_v13  ;;  %v354_v17 = vmul.f32 0.70710677, %v351_v14 }
  0x93   :  { %v82_v18 = vmul.f32 %v81_v16, %v68_v10  ;;  %v107_v19 = vmul.f32 %v354_v17, %v354_v17  ;;  %v71_v20 = vmul.f32 %v70_v15, %v68_v10 }
  0x95   :  { %v83_v21 = vadd.f32 0.014752088, %v82_v18  ;;  %v108_v22 = vmin.f32 %v107_v19, 16.0  ;;  %v72_v27 = vadd.f32 0.0036580483, %v71_v20 }
  0x97   :  { %v84_v23 = vmul.f32 %v83_v21, %v68_v10  ;;  %v109_v25 = vmul.f32 2.1237322e-06, %v108_v22  ;;  %v120_v26 = vmul.f32 3.8918573e-05, %v108_v22  ;;  %v73_v35 = vmul.f32 %v72_v27, %v68_v10 }
  0x98   :  { %v64_v27 = vmul.f32 0.5, %v351_v14 }
  0x99   :  { %v85_v28 = vadd.f32 0.112945676, %v84_v23  ;;  %v110_v29 = vadd.f32 0.00028619796, %v109_v25  ;;  %v121_v30 = vadd.f32 0.001143296, %v120_v26 }
  0x9a   :  { %v74_v42 = vadd.f32 0.05243302, %v73_v35  ;;  %v63_v26 = vmul.f32 0.5, %v344_v7 }
  0x9b   :  { %v86_v31 = vmul.f32 %v85_v28, %v68_v10  ;;  %v111_v33 = vmul.f32 %v110_v29, %v108_v22  ;;  %v122_v34 = vmul.f32 %v121_v30, %v108_v22 }
  0x9c   :  { %v75_v48 = vmul.f32 %v74_v42, %v68_v10 }
  0x9d   :  { %v87_v36 = vadd.f32 0.4994258, %v86_v31  ;;  %v112_v37 = vadd.f32 0.0036580483, %v111_v33  ;;  %v123_v38 = vadd.f32 0.014752088, %v122_v34 }
  0x9e   :  { %v76_v53 = vadd.f32 0.18741608, %v75_v48 }
  0x9f   :  { %v88_v39 = vmul.f32 %v87_v36, %v68_v10  ;;  %v124_v41 = vmul.f32 %v123_v38, %v108_v22  ;;  %v113_v44 = vmul.f32 %v112_v37, %v108_v22 }
  0xa0   :  { %v77_v58 = vmul.f32 %v76_v53, %v68_v10 }
  0xa1   :  { %v89_v43 = vadd.f32 1.0, %v88_v39  ;;  %v125_v45 = vadd.f32 0.112945676, %v124_v41  ;;  %v114_v49 = vadd.f32 0.05243302, %v113_v44 }
  0xa2   :  { %v78_v0 = vadd.f32 1.1283791, %v77_v58 }
  0xa3   :  { %265 = vrcp.f32 %v89_v43  ;;  %v126_v47 = vmul.f32 %v125_v45, %v108_v22  ;;  %v115_v55 = vmul.f32 %v114_v49, %v108_v22  ;;  %v101_v60 = vand.u32 2147483648, %v89_v43 }
  0xa4   :  { %v99_v62 = vand.u32 2147483647, %v89_v43  ;;  %vm95_vm2 = vweird.f32 %v89_v43  ;;  %v79_v9 = vmul.f32 %v78_v0, %v347_v8 }
  0xa5   :  { %v127_v50 = vadd.f32 0.4994258, %v126_v47  ;;  %v116_v61 = vadd.f32 0.18741608, %v115_v55  ;;  %v102_v3 = vor.u32 1.1754944e-38, %v101_v60 }
  0xa6   :  { %vm100_vm4 = vcmp.eq.f32.partialorder %v99_v62, 8.507059e+37 }
  0xa7   :  { %v128_v51 = vmul.f32 %v127_v50, %v108_v22  ;;  %v117_v4 = vmul.f32 %v116_v61, %v108_v22 }
  0xa9   :  { %v266_v52 = vpop.eup %265  ;;  %v129_v56 = vadd.f32 1.0, %v128_v51  ;;  %v118_v10 = vadd.f32 1.1283791, %v117_v4 }
  0xaa   :  { %v91_v54 = vmul.f32 %v266_v52, %v89_v43  ;;  %vm96_vm1 = vweird.f32 %v266_v52 }
  0xab   :  { %267 = vrcp.f32 %v129_v56  ;;  %vm97_vm3 = vmor %vm95_vm2, %vm96_vm1  ;;  %v141_v12 = vand.u32 2147483648, %v129_v56  ;;  %v139_v16 = vand.u32 2147483647, %v129_v56  ;;  %vm135_vm6 = vweird.f32 %v129_v56 }
  0xac   :  { %v92_v57 = vsub.f32 1.0, %v91_v54  ;;  %v119_v21 = vmul.f32 %v118_v10, %v354_v17  ;;  %v264_v17 = vld [vmem:[%s386_s4] ss:$0 sm:$0xff] }
  0xad   :  { %v142_v19 = vor.u32 1.1754944e-38, %v141_v12  ;;  %vm140_vm8 = vcmp.eq.f32.partialorder %v139_v16, 8.507059e+37 }
  0xae   :  { %v93_v59 = vmul.f32 %v266_v52, %v92_v57 }
  0xb0   :  { %v94_v63 = vadd.f32 %v266_v52, %v93_v59 }
  0xb1   :  { %v268_v1 = vpop.eup %267 }
  0xb2   :  { %v98_v2 = vsel %vm97_vm3, %v266_v52, %v94_v63  ;;  %v131_v5 = vmul.f32 %v268_v1, %v129_v56  ;;  %vm136_vm5 = vweird.f32 %v268_v1 }
  0xb3   :  { %v103_v6 = vsel %vm100_vm4, %v102_v3, %v98_v2  ;;  %vm137_vm7 = vmor %vm135_vm6, %vm136_vm5 }
  0xb4   :  { %v132_v11 = vsub.f32 1.0, %v131_v5  ;;  %v104_v13 = vmul.f32 %v103_v6, %v79_v9 }
  0xb6   :  { %v133_v15 = vmul.f32 %v268_v1, %v132_v11  ;;  %v235_v20 = vclamps-f32 %v104_v13, 1.0 }
  0xb8   :  { %v134_v18 = vadd.f32 %v268_v1, %v133_v15  ;;  %v147_v25 = vadd.f32 1.0, %v235_v20 }
  0xba   :  { %v138_v22 = vsel %vm137_vm7, %v268_v1, %v134_v18  ;;  %v149_v29 = vmul.f32 %v147_v25, %v63_v26 }
  0xbb   :  { %v143_v23 = vsel %vm140_vm8, %v142_v19, %v138_v22 }
  0xbc   :  { %v144_v24 = vmul.f32 %v143_v23, %v119_v21 }
  0xbe   :  { %v236_v8 = vclamps-f32 %v144_v24, 1.0 }
  0xc0   :  { %v148_v28 = vadd.f32 1.0, %v236_v8 }
  0xc2   :  { %v150_v30 = vmul.f32 %v148_v28, %v64_v27 }
  0xc4   :  { %v151_v31 = vpack.c.bf16 %v150_v30, %v149_v29 }
  0xc6   :  { %253 = vmatmul.msk.bf16.vlgmr.msra.gmra.mxu1 %vm188_vm9, %v151_v31 }
 0x143   :  { %v201_v32 = vpop.f32.mrf.mxu1 }
 0x144   :  { %v202_v33 = vadd.f32 %v264_v17, %v201_v32 }
 0x146   :  { %206 = vst.msk [vmem:[#allocation2] sm:$0xff] %vm45_vm0, %v202_v33 }
 0x14b   :  { %v203_v7 = vpop.f32.mrf.mxu1 }
 0x14c   :  { %v204_v14 = vadd.f32 %v264_v17, %v203_v7 }
 0x14e   :  { %207 = vst.msk [vmem:[#allocation2 + $0x8] sm:$0xff] %vm45_vm0, %v204_v14 }
 0x14f   :  { %220 = dma.vmem_to_hbm [thread:$0]  %s213_s10, 256, %s215_s13, [#allocation3], %s296_s14, %s296_s14, %s297_s15  }
 0x150   :  { %293 = dma.done.wait [#allocation3], 256  }
 0x151   :  { %294 = vsyncadd [#allocation3], 4294967040 }
 0x152   :  { %225 = vsyncpa [#allocation3], 1 }

</bundles_post_ra>
